<compile_context>
chip_gen: v5e
topology: v5e:2x2
jax: 0.10.0
libtpu: 0.0.40
codegen_flags: <defaults>
</compile_context>

<pallas_src>
import functools

import jax
import jax.numpy as jnp
from jax.experimental import pallas as pl
from jax.experimental.pallas import tpu as pltpu

NEG_BIG = -1e30   # Python float (NOT a jnp array -> would be a captured kernel constant)


def _round_up(x, m):
    return ((x + m - 1) // m) * m


def policy_act_kernel(obs_ref, states_ref, masks_ref,
                      w1_ref, b1_ref, wh_ref, bh_ref,
                      out_ref, states_out_ref,
                      *, num_actions):
    # ---- base: ActorCriticModule (tanh MLP) -------------------------------
    obs = obs_ref[...]                                                    # [TB, D] bf16
    h = jnp.tanh(jnp.dot(obs, w1_ref[...],
                         preferred_element_type=jnp.float32) + b1_ref[...])   # [TB, Hp] f32

    # recurrent internal state, reset where mask == 0
    # TODO(synk): if a recurrent base is substituted, the mask must gate the state fed
    # into the recurrence, not just the output.
    states_out_ref[...] = states_ref[...] * masks_ref[...]                # [TB, S]

    # ---- fused dist-logits + value head (single MXU matmul, 128-lane wide) ----
    head = jnp.dot(h.astype(jnp.bfloat16), wh_ref[...],
                   preferred_element_type=jnp.float32) + bh_ref[...]      # [TB, Apad]
    a_pad = head.shape[-1]
    lane = jax.lax.broadcasted_iota(jnp.int32, head.shape, 1)             # [TB, Apad]
    valid = lane < num_actions

    # critic value lives in column `num_actions` of the fused head: static lane slice
    value = head[:, num_actions:num_actions + 1]                          # [TB, 1]

    logits = jnp.where(valid, head, NEG_BIG)                              # padded lanes killed

    # ---- Categorical: softmax (no explicit log-softmax needed) ------------
    m = jnp.max(logits, axis=-1, keepdims=True)
    z = logits - m
    e = jnp.exp(z)
    denom = jnp.sum(e, axis=-1, keepdims=True)
    probs = e * pl.reciprocal(denom, approx=True)                         # EUP slot
    log_denom = jnp.log(denom)

    # deterministic action = dist.mode() = argmax (first-occurrence tie-break, reuse m)
    # TODO(synk): stochastic dist.sample() path would need pltpu.prng_* (Gumbel-max trick)
    is_max = logits == m
    action = jnp.min(jnp.where(is_max, lane, a_pad), axis=-1, keepdims=True)   # [TB,1] int32

    # log-prob of the argmax action: z[action] == 0  =>  logp[action] = -log(denom)
    alp = -log_denom                                                      # [TB, 1]

    # per-row entropy: -sum(p * logp) = log(denom) - sum(p * z)
    ent_rows = log_denom - jnp.sum(probs * z, axis=-1, keepdims=True)     # [TB, 1]

    # ---- single merged lane-dense output ----------------------------------
    # lanes [0, A): probs | lane A: value | A+1: alp | A+2: ent_row | A+3: action (f32)
    packed = jnp.where(valid, probs,
             jnp.where(lane == num_actions, value,
             jnp.where(lane == num_actions + 1, alp,
             jnp.where(lane == num_actions + 2, ent_rows,
             jnp.where(lane == num_actions + 3, action.astype(jnp.float32),
                       jnp.zeros_like(head))))))
    out_ref[...] = packed                                                 # [TB, Apad] f32


def policy_act(obs, states, masks, params, deterministic=True):
    B, D = obs.shape
    S = states.shape[1]
    H = params["w1"].shape[1]
    A = params["wd"].shape[1]

    # lanes: A logits + 1 value column + 3 packed scalar lanes, rounded to 128
    A_pad = _round_up(A + 4, 128)
    H_pad = _round_up(H, 128)

    # Fused head: columns [0, A) = dist logits, column A = critic value, rest zero-pad.
    w_head = jnp.concatenate(
        [params["wd"], params["wv"], jnp.zeros((H, A_pad - A - 1), jnp.float32)], axis=1)
    b_head = jnp.concatenate(
        [params["bd"], params["bv"], jnp.zeros((1, A_pad - A - 1), jnp.float32)], axis=1)

    # Zero-pad hidden dim to a lane-dense multiple of 128 (tanh(0)=0, zero head rows
    # contribute nothing -> mathematically identical).
    if H_pad > H:
        w1 = jnp.concatenate([params["w1"], jnp.zeros((D, H_pad - H), jnp.float32)], axis=1)
        b1 = jnp.concatenate([params["b1"], jnp.zeros((1, H_pad - H), jnp.float32)], axis=1)
        w_head = jnp.concatenate([w_head, jnp.zeros((H_pad - H, A_pad), jnp.float32)], axis=0)
    else:
        w1, b1 = params["w1"], params["b1"]

    # bf16 matmul inputs (halves dominant HBM read stream), f32 biases / accumulation.
    obs_bf = obs.astype(jnp.bfloat16)
    w1_bf = w1.astype(jnp.bfloat16)
    wh_bf = w_head.astype(jnp.bfloat16)

    # Batch tiling: full extent for small B; for large B ensure >= 2 grid steps
    # (v7x has 2 TensorCores) and grow blocks up to 1024 rows (v5e/v6e: fewer steps).
    if B <= 512:
        TB = B
    else:
        TB = min(1024, _round_up(pl.cdiv(B, 2), 8))
    grid = (pl.cdiv(B, TB),)

    out_shapes = (
        jax.ShapeDtypeStruct((B, A_pad), jnp.float32),   # probs | value | alp | ent | action
        jax.ShapeDtypeStruct((B, S), jnp.float32),       # states'
    )
    in_specs = [
        pl.BlockSpec((TB, D), lambda i: (i, 0)),         # obs
        pl.BlockSpec((TB, S), lambda i: (i, 0)),         # states
        pl.BlockSpec((TB, 1), lambda i: (i, 0)),         # masks
        pl.BlockSpec((D, H_pad), lambda i: (0, 0)),      # w1   (resident weights)
        pl.BlockSpec((1, H_pad), lambda i: (0, 0)),      # b1
        pl.BlockSpec((H_pad, A_pad), lambda i: (0, 0)),  # fused head weights
        pl.BlockSpec((1, A_pad), lambda i: (0, 0)),      # fused head bias
    ]
    out_specs = (
        pl.BlockSpec((TB, A_pad), lambda i: (i, 0)),
        pl.BlockSpec((TB, S), lambda i: (i, 0)),
    )

    packed, states_out = pl.pallas_call(
        functools.partial(policy_act_kernel, num_actions=A),
        out_shape=out_shapes,
        grid=grid,
        in_specs=in_specs,
        out_specs=out_specs,
        compiler_params=pltpu.CompilerParams(
            dimension_semantics=("parallel",),           # shards batch across v7x's 2 TCs
            vmem_limit_bytes=48 * 1024 * 1024,           # <= v7x's 64 MiB physical VMEM
        ),
    )(obs_bf, states, masks, w1_bf, b1, wh_bf, b_head)

    probs = packed[:, :A]
    value = packed[:, A:A + 1]
    action_log_probs = packed[:, A + 1:A + 2]
    ent_rows = packed[:, A + 2:A + 3]
    action = packed[:, A + 3:A + 4].astype(jnp.int32)
    entropy = jnp.mean(ent_rows)                         # cross-batch mean in wrapper
    perplexity = jnp.exp(entropy)
    return value, action, action_log_probs, states_out, probs, entropy, perplexity


def make_params(key, obs_dim, hidden, num_actions):
    ks = jax.random.split(key, 6)
    scale = 0.1
    return {
        # base MLP (actor features)
        "w1": scale * jax.random.normal(ks[0], (obs_dim, hidden), jnp.float32),
        "b1": scale * jax.random.normal(ks[1], (1, hidden), jnp.float32),
        # critic head
        "wv": scale * jax.random.normal(ks[2], (hidden, 1), jnp.float32),
        "bv": scale * jax.random.normal(ks[3], (1, 1), jnp.float32),
        # Categorical dist head
        "wd": scale * jax.random.normal(ks[4], (hidden, num_actions), jnp.float32),
        "bd": scale * jax.random.normal(ks[5], (1, num_actions), jnp.float32),
    }


if __name__ == "__main__":
    B, OBS_DIM, HIDDEN, STATE, NUM_ACTIONS = 8, 64, 32, 32, 6

    key = jax.random.PRNGKey(0)
    k_obs, k_st, k_par = jax.random.split(key, 3)

    obs = jax.random.normal(k_obs, (B, OBS_DIM), jnp.float32)
    states = jax.random.normal(k_st, (B, STATE), jnp.float32)
    masks = (jnp.arange(B) % 2).astype(jnp.float32).reshape(B, 1)   # episode-done masks
    params = make_params(k_par, OBS_DIM, HIDDEN, NUM_ACTIONS)

    outs = policy_act(obs, states, masks, params)
    value, action, alp, states_out, probs, entropy, perplexity = jax.block_until_ready(outs)

    # ---- pure-JAX reference with the same bf16-input / f32-accum math ----
    obs_bf = obs.astype(jnp.bfloat16)
    w1_bf = params["w1"].astype(jnp.bfloat16)
    h_ref = jnp.tanh(jnp.dot(obs_bf, w1_bf, preferred_element_type=jnp.float32) + params["b1"])
    h_bf = h_ref.astype(jnp.bfloat16)
    logits_ref = jnp.dot(h_bf, params["wd"].astype(jnp.bfloat16),
                         preferred_element_type=jnp.float32) + params["bd"]
    value_ref = jnp.dot(h_bf, params["wv"].astype(jnp.bfloat16),
                        preferred_element_type=jnp.float32) + params["bv"]
    p_ref = jax.nn.softmax(logits_ref, axis=-1)
    logp_ref = jax.nn.log_softmax(logits_ref, axis=-1)
    act_ref = jnp.argmax(logits_ref, axis=-1).astype(jnp.int32)
    alp_ref = jnp.take_along_axis(logp_ref, act_ref[:, None], axis=1)
    ent_ref = -jnp.mean(jnp.sum(p_ref * logp_ref, axis=-1))

    assert jnp.allclose(probs, p_ref, atol=5e-3), "probs mismatch"
    assert jnp.allclose(value, value_ref, atol=1e-2), "value mismatch"
    assert jnp.allclose(alp, alp_ref, atol=5e-3), "action_log_probs mismatch"
    assert jnp.allclose(states_out, states * masks, atol=1e-6), "states mismatch"
    assert jnp.allclose(entropy, ent_ref, atol=5e-3), "entropy mismatch"
    assert jnp.allclose(perplexity, jnp.exp(ent_ref), atol=2e-2), "perplexity mismatch"
    assert jnp.array_equal(action[:, 0], act_ref), "action mismatch"

    print("KERNEL_OK")
</pallas_src>

<mosaic_0001>
module attributes {stable_mosaic.version = 11 : i64} {
  func.func @policy_act_kernel(%arg0: i32, %arg1: memref<8x64xbf16, #tpu.memory_space<vmem>>, %arg2: memref<8x32xf32, #tpu.memory_space<vmem>>, %arg3: memref<8x1xf32, #tpu.memory_space<vmem>>, %arg4: memref<64x128xbf16, #tpu.memory_space<vmem>>, %arg5: memref<1x128xf32, #tpu.memory_space<vmem>>, %arg6: memref<128x128xbf16, #tpu.memory_space<vmem>>, %arg7: memref<1x128xf32, #tpu.memory_space<vmem>>, %arg8: memref<8x128xf32, #tpu.memory_space<vmem>>, %arg9: memref<8x32xf32, #tpu.memory_space<vmem>>) attributes {dimension_semantics = [#tpu.dimension_semantics<parallel>], iteration_bounds = array<i64: 1>, scalar_prefetch = 0 : i64, scratch_operands = 0 : i64, tpu.core_type = #tpu.core_type<tc>, window_params = [{transform_indices = @transform_0, window_bounds = array<i64: 8, 64>}, {transform_indices = @transform_1, window_bounds = array<i64: 8, 32>}, {transform_indices = @transform_2, window_bounds = array<i64: 8, 1>}, {pipeline_mode = #tpu.pipeline_mode<synchronous>, transform_indices = @transform_3, window_bounds = array<i64: 64, 128>}, {pipeline_mode = #tpu.pipeline_mode<synchronous>, transform_indices = @transform_4, window_bounds = array<i64: 1, 128>}, {pipeline_mode = #tpu.pipeline_mode<synchronous>, transform_indices = @transform_5, window_bounds = array<i64: 128, 128>}, {pipeline_mode = #tpu.pipeline_mode<synchronous>, transform_indices = @transform_6, window_bounds = array<i64: 1, 128>}, {transform_indices = @transform_7, window_bounds = array<i64: 8, 128>}, {transform_indices = @transform_8, window_bounds = array<i64: 8, 32>}]} {
    %c0 = arith.constant 0 : index
    %c0_0 = arith.constant 0 : index
    %0 = vector.load %arg1[%c0, %c0_0] : memref<8x64xbf16, #tpu.memory_space<vmem>>, vector<8x64xbf16>
    %c0_1 = arith.constant 0 : index
    %c0_2 = arith.constant 0 : index
    %1 = vector.load %arg4[%c0_1, %c0_2] : memref<64x128xbf16, #tpu.memory_space<vmem>>, vector<64x128xbf16>
    %cst = arith.constant dense<0.000000e+00> : vector<8x128xf32>
    %2 = tpu.matmul %0, %1, %cst {dimension_numbers = #tpu.dot_dimension_numbers<[1], [0], [0], [1], [0, 0, 1, 1], [], []>} : vector<8x64xbf16>, vector<64x128xbf16>, vector<8x128xf32> -> vector<8x128xf32>
    %c0_3 = arith.constant 0 : index
    %c0_4 = arith.constant 0 : index
    %3 = vector.load %arg5[%c0_3, %c0_4] : memref<1x128xf32, #tpu.memory_space<vmem>>, vector<1x128xf32>
    %4 = vector.broadcast %3 : vector<1x128xf32> to vector<8x128xf32>
    %5 = arith.addf %2, %4 : vector<8x128xf32>
    %6 = math.tanh %5 : vector<8x128xf32>
    %c0_5 = arith.constant 0 : index
    %c0_6 = arith.constant 0 : index
    %7 = vector.load %arg2[%c0_5, %c0_6] : memref<8x32xf32, #tpu.memory_space<vmem>>, vector<8x32xf32>
    %c0_7 = arith.constant 0 : index
    %c0_8 = arith.constant 0 : index
    %8 = vector.load %arg3[%c0_7, %c0_8] : memref<8x1xf32, #tpu.memory_space<vmem>>, vector<8x1xf32>
    %9 = vector.broadcast %8 : vector<8x1xf32> to vector<8x32xf32>
    %10 = arith.mulf %7, %9 : vector<8x32xf32>
    %c0_9 = arith.constant 0 : index
    %c0_10 = arith.constant 0 : index
    %11 = vector.load %arg9[%c0_9, %c0_10] : memref<8x32xf32, #tpu.memory_space<vmem>>, vector<8x32xf32>
    tpu.vector_store %arg9[%c0_9, %c0_10], %10 {strides = array<i32>} : memref<8x32xf32, #tpu.memory_space<vmem>>, vector<8x32xf32>,
    %12 = arith.truncf %6 : vector<8x128xf32> to vector<8x128xbf16>
    %c0_11 = arith.constant 0 : index
    %c0_12 = arith.constant 0 : index
    %13 = vector.load %arg6[%c0_11, %c0_12] : memref<128x128xbf16, #tpu.memory_space<vmem>>, vector<128x128xbf16>
    %cst_13 = arith.constant dense<0.000000e+00> : vector<8x128xf32>
    %14 = tpu.matmul %12, %13, %cst_13 {dimension_numbers = #tpu.dot_dimension_numbers<[1], [0], [0], [1], [0, 0, 1, 1], [], []>} : vector<8x128xbf16>, vector<128x128xbf16>, vector<8x128xf32> -> vector<8x128xf32>
    %c0_14 = arith.constant 0 : index
    %c0_15 = arith.constant 0 : index
    %15 = vector.load %arg7[%c0_14, %c0_15] : memref<1x128xf32, #tpu.memory_space<vmem>>, vector<1x128xf32>
    %16 = vector.broadcast %15 : vector<1x128xf32> to vector<8x128xf32>
    %17 = arith.addf %14, %16 : vector<8x128xf32>
    %18 = tpu.iota {dimensions = array<i32: 1>} : vector<8x128xi32>
    %c6_i32 = arith.constant 6 : i32
    %19 = vector.broadcast %c6_i32 : i32 to vector<8x128xi32>
    %20 = arith.cmpi slt, %18, %19 : vector<8x128xi32>
    %21 = vector.extract_strided_slice %17 {offsets = [0, 6], sizes = [8, 1], strides = [1, 1]} : vector<8x128xf32> to vector<8x1xf32>
    %cst_16 = arith.constant -1.000000e+30 : f32
    %22 = vector.broadcast %cst_16 : f32 to vector<8x128xf32>
    %23 = arith.select %20, %17, %22 : vector<8x128xi1>, vector<8x128xf32>
    %cst_17 = arith.constant dense<0xFF800000> : vector<8xf32>
    %24 = vector.multi_reduction <maximumf>, %23, %cst_17 [1] : vector<8x128xf32> to vector<8xf32>
    %25 = vector.shape_cast %24 : vector<8xf32> to vector<8x1xf32>
    %26 = vector.broadcast %25 : vector<8x1xf32> to vector<8x128xf32>
    %27 = arith.subf %23, %26 : vector<8x128xf32>
    %28 = math.exp %27 : vector<8x128xf32>
    %cst_18 = arith.constant dense<0.000000e+00> : vector<8xf32>
    %29 = vector.multi_reduction <add>, %28, %cst_18 [1] : vector<8x128xf32> to vector<8xf32>
    %30 = vector.shape_cast %29 : vector<8xf32> to vector<8x1xf32>
    %31 = tpu.reciprocal %30 {approx = true} : vector<8x1xf32> -> vector<8x1xf32>
    %32 = vector.broadcast %31 : vector<8x1xf32> to vector<8x128xf32>
    %33 = arith.mulf %28, %32 : vector<8x128xf32>
    %34 = math.log %30 : vector<8x1xf32>
    %35 = vector.broadcast %25 : vector<8x1xf32> to vector<8x128xf32>
    %36 = arith.cmpf oeq, %23, %35 : vector<8x128xf32>
    %c128_i32 = arith.constant 128 : i32
    %37 = vector.broadcast %c128_i32 : i32 to vector<8x128xi32>
    %38 = arith.select %36, %18, %37 : vector<8x128xi1>, vector<8x128xi32>
    %cst_19 = arith.constant dense<2147483647> : vector<8xi32>
    %39 = vector.multi_reduction <minsi>, %38, %cst_19 [1] : vector<8x128xi32> to vector<8xi32>
    %40 = vector.shape_cast %39 : vector<8xi32> to vector<8x1xi32>
    %cst_20 = arith.constant 0.000000e+00 : f32
    %41 = vector.broadcast %cst_20 : f32 to vector<8x1xf32>
    %42 = arith.subf %41, %34 : vector<8x1xf32>
    %43 = arith.mulf %33, %27 : vector<8x128xf32>
    %cst_21 = arith.constant dense<0.000000e+00> : vector<8xf32>
    %44 = vector.multi_reduction <add>, %43, %cst_21 [1] : vector<8x128xf32> to vector<8xf32>
    %45 = vector.shape_cast %44 : vector<8xf32> to vector<8x1xf32>
    %46 = arith.subf %34, %45 : vector<8x1xf32>
    %c6_i32_22 = arith.constant 6 : i32
    %47 = vector.broadcast %c6_i32_22 : i32 to vector<8x128xi32>
    %48 = arith.cmpi eq, %18, %47 : vector<8x128xi32>
    %c7_i32 = arith.constant 7 : i32
    %49 = vector.broadcast %c7_i32 : i32 to vector<8x128xi32>
    %50 = arith.cmpi eq, %18, %49 : vector<8x128xi32>
    %c8_i32 = arith.constant 8 : i32
    %51 = vector.broadcast %c8_i32 : i32 to vector<8x128xi32>
    %52 = arith.cmpi eq, %18, %51 : vector<8x128xi32>
    %c9_i32 = arith.constant 9 : i32
    %53 = vector.broadcast %c9_i32 : i32 to vector<8x128xi32>
    %54 = arith.cmpi eq, %18, %53 : vector<8x128xi32>
    %55 = arith.sitofp %40 : vector<8x1xi32> to vector<8x1xf32>
    %cst_23 = arith.constant 0.000000e+00 : f32
    %56 = vector.broadcast %cst_23 : f32 to vector<8x128xf32>
    %57 = vector.shape_cast %55 : vector<8x1xf32> to vector<8x1xf32>
    %58 = vector.broadcast %57 : vector<8x1xf32> to vector<8x128xf32>
    %59 = arith.select %54, %58, %56 : vector<8x128xi1>, vector<8x128xf32>
    %60 = vector.shape_cast %46 : vector<8x1xf32> to vector<8x1xf32>
    %61 = vector.broadcast %60 : vector<8x1xf32> to vector<8x128xf32>
    %62 = arith.select %52, %61, %59 : vector<8x128xi1>, vector<8x128xf32>
    %63 = vector.shape_cast %42 : vector<8x1xf32> to vector<8x1xf32>
    %64 = vector.broadcast %63 : vector<8x1xf32> to vector<8x128xf32>
    %65 = arith.select %50, %64, %62 : vector<8x128xi1>, vector<8x128xf32>
    %66 = vector.shape_cast %21 : vector<8x1xf32> to vector<8x1xf32>
    %67 = vector.broadcast %66 : vector<8x1xf32> to vector<8x128xf32>
    %68 = arith.select %48, %67, %65 : vector<8x128xi1>, vector<8x128xf32>
    %69 = arith.select %20, %33, %68 : vector<8x128xi1>, vector<8x128xf32>
    %c0_24 = arith.constant 0 : index
    %c0_25 = arith.constant 0 : index
    %70 = vector.load %arg8[%c0_24, %c0_25] : memref<8x128xf32, #tpu.memory_space<vmem>>, vector<8x128xf32>
    tpu.vector_store %arg8[%c0_24, %c0_25], %69 {strides = array<i32>} : memref<8x128xf32, #tpu.memory_space<vmem>>, vector<8x128xf32>,
    return
  }
  func.func @transform_0(%arg0: i32) -> (i32, i32) {
    %c0_i32 = arith.constant 0 : i32
    %c0_i32_0 = arith.constant 0 : i32
    return %arg0, %c0_i32 : i32, i32
  }
  func.func @transform_1(%arg0: i32) -> (i32, i32) {
    %c0_i32 = arith.constant 0 : i32
    %c0_i32_0 = arith.constant 0 : i32
    return %arg0, %c0_i32 : i32, i32
  }
  func.func @transform_2(%arg0: i32) -> (i32, i32) {
    %c0_i32 = arith.constant 0 : i32
    %c0_i32_0 = arith.constant 0 : i32
    return %arg0, %c0_i32 : i32, i32
  }
  func.func @transform_3(%arg0: i32) -> (i32, i32) {
    %c0_i32 = arith.constant 0 : i32
    %c0_i32_0 = arith.constant 0 : i32
    %c0_i32_1 = arith.constant 0 : i32
    return %c0_i32, %c0_i32_0 : i32, i32
  }
  func.func @transform_4(%arg0: i32) -> (i32, i32) {
    %c0_i32 = arith.constant 0 : i32
    %c0_i32_0 = arith.constant 0 : i32
    %c0_i32_1 = arith.constant 0 : i32
    return %c0_i32, %c0_i32_0 : i32, i32
  }
  func.func @transform_5(%arg0: i32) -> (i32, i32) {
    %c0_i32 = arith.constant 0 : i32
    %c0_i32_0 = arith.constant 0 : i32
    %c0_i32_1 = arith.constant 0 : i32
    return %c0_i32, %c0_i32_0 : i32, i32
  }
  func.func @transform_6(%arg0: i32) -> (i32, i32) {
    %c0_i32 = arith.constant 0 : i32
    %c0_i32_0 = arith.constant 0 : i32
    %c0_i32_1 = arith.constant 0 : i32
    return %c0_i32, %c0_i32_0 : i32, i32
  }
  func.func @transform_7(%arg0: i32) -> (i32, i32) {
    %c0_i32 = arith.constant 0 : i32
    %c0_i32_0 = arith.constant 0 : i32
    return %arg0, %c0_i32 : i32, i32
  }
  func.func @transform_8(%arg0: i32) -> (i32, i32) {
    %c0_i32 = arith.constant 0 : i32
    %c0_i32_0 = arith.constant 0 : i32
    return %arg0, %c0_i32 : i32, i32
  }
}

</mosaic_0001>

<bundles_post_ra>
// kernel: tpu_custom_call.1
= control target key start
LH: loop header
LB: loop body
LE: loop exit
PB: predicated region body
PF: predicated region fallthrough
CT: control target
= control target key end

     0   :  { %14 = vsyncpa [#allocation3], 0  ;;  %s612_s0 = inlined_call_operand.hbm [shape: bf16[8,64], index: 0, kind: input, shape index: {}]   ;;  %s613_s1 = inlined_call_operand.vmem [shape: f32[8,32], index: 1, kind: input, shape index: {}]   ;;  %s614_s2 = inlined_call_operand.vmem [shape: f32[8,1], index: 2, kind: input, shape index: {}]   ;;  %s615_s3 = inlined_call_operand.hbm [shape: bf16[64,128], index: 3, kind: input, shape index: {}]   ;;  %s616_s4 = inlined_call_operand.vmem [shape: f32[1,128], index: 4, kind: input, shape index: {}]   ;;  %s617_s5 = inlined_call_operand.hbm [shape: bf16[128,128], index: 5, kind: input, shape index: {}]   ;;  %s618_s6 = inlined_call_operand.vmem [shape: f32[1,128], index: 6, kind: input, shape index: {}]   ;;  %s619_s7 = inlined_call_operand.hbm [shape: f32[8,128], index: 7, kind: output, shape index: {0}]   ;;  %s620_s8 = inlined_call_operand.hbm [shape: f32[8,32], index: 8, kind: output, shape index: {1}]  }
   0x1   :  { %15 = vsyncpa [#allocation6], 0 }
   0x2   :  { %16 = vsyncpa [#allocation4], 0  ;;  %s37_s29 = sshll.u32 %s615_s3, 4  ;;  %s38_s29 = int_to_ptr.hbm [resolvable:$true] %s37_s29 }
   0x3   :  { %17 = vsyncpa [#allocation10], 0  ;;  %s519_s30 = smov [#allocation5]   ;;  %s23_s12 = sshll.u32 %s612_s0, 4  ;;  %s24_s12 = int_to_ptr.hbm [resolvable:$true] %s23_s12 }
   0x4   :  { %s39_s9 = sshll.u32 %s519_s30, 4  ;;  %s520_s13 = smov 64   ;;  %s40_s9 = int_to_ptr.vmem [resolvable:$true] %s39_s9 }
   0x5   :  { %s521_s14 = smov 4   ;;  %s522_s15 = smov [#allocation2]  }
   0x6   :  { %45 = dma.hbm_to_vmem [thread:$0]  %s38_s29, 512, %s40_s9, [#allocation6], %s520_s13, %s520_s13, %s521_s14  }
   0x7   :  { %s25_s16 = sshll.u32 %s522_s15, 4  ;;  %s52_s19 = sshll.u32 %s617_s5, 4  ;;  %s26_s16 = int_to_ptr.vmem [resolvable:$true] %s25_s16  ;;  %s53_s19 = int_to_ptr.hbm [resolvable:$true] %s52_s19 }
   0x8   :  { %28 = dma.hbm_to_vmem [thread:$0]  %s24_s12, 64, %s26_s16, [#allocation3]  }
   0x9   :  { %s523_s3 = smov [#allocation7]  }
   0xa   :  { %s54_s20 = sshll.u32 %s523_s3, 4  ;;  %s55_s20 = int_to_ptr.vmem [resolvable:$true] %s54_s20 }
   0xb   :  { %60 = dma.hbm_to_vmem [thread:$0]  %s53_s19, 1024, %s55_s20, [#allocation6], %s520_s13, %s520_s13, %s521_s14  }
   0xc   :  { %511 = dma.done.wait [#allocation3], 64  }
   0xd   :  { %512 = vsyncadd [#allocation3], 4294967232 }
   0xe   :  { %513 = dma.done.wait [#allocation6], 1536  }
   0xf   :  { %514 = vsyncadd [#allocation6], 4294965760  ;;  %v361_v0 = vld [vmem:[#allocation5 + $0x18] sm:$0xff]  ;;  %v360_v2 = vld [vmem:[#allocation5 + $0x10] sm:$0xff]  ;;  %vm113_vm0 = vcmask 523264   ;;  %v223_v19 = vlaneseq  ;;  %v524_v26 = vmov 6  }
  0x10   :  { %v369_v1 = vld [vmem:[#allocation7 + $0x38] sm:$0xff]  ;;  %121 = vmatpush.bf16.msra.mxu0 %v361_v0  ;;  %v368_v3 = vld [vmem:[#allocation7 + $0x30] sm:$0xff]  ;;  %v359_v4 = vld [vmem:[#allocation5 + $0x8] sm:$0xff]  ;;  %380 = vset.pattern.permute.xlu0 %v524_v26  ;;  %v525_v34 = vmov 0   ;;  %s282_s26 = sshll.u32 %s619_s7, 4  ;;  %s527_s29 = smov [#allocation9]   ;;  %s283_s26 = int_to_ptr.hbm [resolvable:$true] %s282_s26 }
  0x11   :  { %210 = vmatpush.bf16.msra.mxu1 %v369_v1  ;;  %v367_v5 = vld [vmem:[#allocation7 + $0x28] sm:$0xff]  ;;  %v358_v6 = vld [vmem:[#allocation5] sm:$0xff]  ;;  %v76_v8 = vld [vmem:[#allocation2] sm:$0xf]  ;;  %v585_v20 = vand.u32 127, %v223_v19  ;;  %379 = vset.pattern.permute.xlu2 %v525_v34  ;;  %s291_s30 = sshll.u32 %s527_s29, 4  ;;  %s292_s30 = int_to_ptr.vmem [resolvable:$true] %s291_s30 }
  0x12   :  { %v366_v7 = vld [vmem:[#allocation7 + $0x20] sm:$0xff]  ;;  %v365_v9 = vld [vmem:[#allocation7 + $0x18] sm:$0xff]  ;;  %v364_v10 = vld [vmem:[#allocation7 + $0x10] sm:$0xff]  ;;  %s293_s11 = sshll.u32 %s620_s8, 4  ;;  %vm139_vm8 = vcmask 261120   ;;  %s294_s11 = int_to_ptr.hbm [resolvable:$true] %s293_s11 }
  0x13   :  { %v363_v11 = vld [vmem:[#allocation7 + $0x8] sm:$0xff]  ;;  %v362_v12 = vld [vmem:[#allocation7] sm:$0xff]  ;;  %v381_v13 = vld [vmem:[%s616_s4] ss:$0 sm:$0xff]  ;;  %vm225_vm1 = vcmp.lt.s32.totalorder %v585_v20, 6  ;;  %vm262_vm4 = vcmp.eq.s32.totalorder %v585_v20, 9 }
  0x14   :  { %122 = vmatpush.bf16.msra.mxu0 %v360_v2  ;;  %v382_v21 = vld [vmem:[%s618_s6] ss:$0 sm:$0xff]  ;;  %vm261_vm5 = vcmp.eq.s32.totalorder %v585_v20, 8  ;;  %vm260_vm6 = vcmp.eq.s32.totalorder %v585_v20, 7  ;;  %vm259_vm7 = vcmp.eq.s32.totalorder %v585_v20, 6 }
  0x15   :  { %211 = vmatpush.bf16.msra.mxu1 %v368_v3  ;;  %v132_v43 = vld [vmem:[%s614_s2] sm:$0xff]  ;;  %s526_s2 = smov [#allocation8]  }
  0x16   :  { %s280_s23 = sshll.u32 %s526_s2, 4  ;;  %v131_v60 = vld [vmem:[%s613_s1] sm:$0xff]  ;;  %s281_s23 = int_to_ptr.vmem [resolvable:$true] %s280_s23 }
  0x18   :  { %123 = vmatpush.bf16.msra.mxu0 %v359_v4 }
  0x19   :  { %212 = vmatpush.bf16.msra.mxu1 %v367_v5 }
  0x1c   :  { %124 = vmatpush.bf16.msra.mxu0 %v358_v6 }
  0x1d   :  { %213 = vmatpush.bf16.msra.mxu1 %v366_v7 }
  0x1f   :  { %325 = vmatmul.msk.bf16.vlgmr.msra.gmra.mxu0 %vm113_vm0, %v76_v8 }
  0x21   :  { %214 = vmatpush.bf16.msra.mxu1 %v365_v9 }
  0x25   :  { %215 = vmatpush.bf16.msra.mxu1 %v364_v10 }
  0x29   :  { %216 = vmatpush.bf16.msra.mxu1 %v363_v11 }
  0x2d   :  { %217 = vmatpush.bf16.msra.mxu1 %v362_v12 }
  0x9c   :  { %v126_v14 = vpop.f32.mrf.mxu0 }
  0x9d   :  { %v127_v15 = vadd.f32 %v381_v13, %v126_v14 }
  0x9f   :  { %383 = vtanh.f32 %v127_v15 }
  0xa4   :  { %v128_v16 = vpop.f32.mrf.mxu0 }
  0xa5   :  { %v384_v17 = vpop.eup %383 }
  0xa6   :  { %v141_v18 = vpack.c.bf16 %v384_v17, %v384_v17 }
  0xa8   :  { %218 = vmatmul.bf16.vlgmr.msra.gmra.mxu1 %v141_v18 }
 0x125   :  { %v219_v22 = vpop.f32.mrf.mxu1 }
 0x126   :  { %v220_v23 = vadd.f32 %v382_v21, %v219_v22 }
 0x128   :  { %v226_v24 = vsel %vm225_vm1, %v220_v23, -1e+30 }
 0x129   :  { %227 = vmax.xlane.f32.xlu0 %v226_v24 }
 0x12d   :  { %v221_v25 = vpop.f32.mrf.mxu1 }
 0x19c   :  { %v228_v27 = vpop.xlane.xlu0 %227 }
 0x19d   :  { %v229_v28 = vsub.f32 %v226_v24, %v228_v27  ;;  %vm238_vm2 = vcmp.eq.f32.partialorder %v226_v24, %v228_v27 }
 0x19e   :  { %v239_v29 = vsel %vm238_vm2, %v585_v20, 128 }
 0x19f   :  { %v230_v30 = vmul.f32 1.442695, %v229_v28  ;;  %v241_v31 = vshra.s32 %v239_v29, 16  ;;  %v240_v35 = vand.u32 65535, %v239_v29 }
 0x1a1   :  { %385 = vpow2.f32 %v230_v30  ;;  %v243_v32 = vcvt.s32.f32 %v241_v31  ;;  %v242_v37 = vcvt.s32.f32 %v240_v35 }
 0x1a3   :  { %244 = vmin.xlane.f32.xlu1 %v243_v32 }
 0x1a7   :  { %v386_v33 = vpop.eup %385 }
 0x1a8   :  { %232 = vadd.xlane.f32.xlu0 %v386_v33 }
 0x1bc   :  { %269 = vperm.xlu0 %380, %v220_v23  }
 0x216   :  { %v245_v36 = vpop.xlane.xlu1 %244 }
 0x217   :  { %vm246_vm3 = vcmp.eq.f32.partialorder %v243_v32, %v245_v36  ;;  %v251_v45 = vcvt.f32.s32 %v245_v36 }
 0x218   :  { %v247_v38 = vsel %vm246_vm3, %v242_v37, inf }
 0x219   :  { %248 = vmin.xlane.f32.xlu1 %v247_v38  ;;  %v252_v47 = vshll.u32 %v251_v45, 16 }
 0x21b   :  { %v233_v39 = vpop.xlane.xlu0 %232 }
 0x21c   :  { %387 = vrcp.f32 %v233_v39 }
 0x21d   :  { %389 = vlog2.f32 %v233_v39 }
 0x222   :  { %v388_v40 = vpop.eup %387 }
 0x223   :  { %v235_v41 = vmul.f32 %v388_v40, %v386_v33  ;;  %v390_v49 = vpop.eup %389 }
 0x224   :  { %v237_v51 = vmul.f32 0.6931472, %v390_v49 }
 0x225   :  { %v255_v42 = vmul.f32 %v235_v41, %v229_v28 }
 0x226   :  { %v254_v55 = vsub.f32 0.0, %v237_v51 }
 0x227   :  { %256 = vadd.xlane.f32.xlu2 %v255_v42 }
 0x22e   :  { %v270_v57 = vpop.permute.xlu0 %269 }
 0x23f   :  { %135 = vperm.xlu2 %379, %v132_v43  }
 0x28c   :  { %v249_v44 = vpop.xlane.xlu1 %248 }
 0x28d   :  { %v250_v46 = vcvt.f32.s32 %v249_v44 }
 0x28f   :  { %v253_v48 = vadd.s32 %v252_v47, %v250_v46 }
 0x291   :  { %v263_v50 = vcvt.s32.f32 %v253_v48 }
 0x293   :  { %v264_v54 = vsel %vm262_vm4, %v263_v50, 0.0 }
 0x29a   :  { %v257_v52 = vpop.xlane.xlu2 %256 }
 0x29b   :  { %v258_v53 = vsub.f32 %v237_v51, %v257_v52 }
 0x29d   :  { %v265_v56 = vsel %vm261_vm5, %v258_v53, %v264_v54 }
 0x29e   :  { %v266_v58 = vsel %vm260_vm6, %v254_v55, %v265_v56 }
 0x29f   :  { %v272_v59 = vsel %vm259_vm7, %v270_v57, %v266_v58 }
 0x2a0   :  { %v273_v61 = vsel %vm225_vm1, %v235_v41, %v272_v59 }
 0x2a1   :  { %274 = vst [vmem:[#allocation8] sm:$0xff] %v273_v61 }
 0x2a2   :  { %v136_v62 = vpop.permute.xlu2 %135  ;;  %285 = dma.vmem_to_hbm [thread:$0]  %s281_s23, 128, %s283_s26, [#allocation4]  }
 0x2a3   :  { %v138_v63 = vmul.f32 %v136_v62, %v131_v60 }
 0x2a5   :  { %140 = vst.msk [vmem:[#allocation9] sm:$0xff] %vm139_vm8, %v138_v63 }
 0x2a6   :  { %296 = dma.vmem_to_hbm [thread:$0]  %s292_s30, 128, %s294_s11, [#allocation10]  }
 0x2a7   :  { %515 = dma.done.wait [#allocation4], 128  }
 0x2a8   :  { %516 = vsyncadd [#allocation4], 4294967168 }
 0x2a9   :  { %517 = dma.done.wait [#allocation10], 128  }
 0x2aa   :  { %518 = vsyncadd [#allocation10], 4294967168 }
 0x2ab   :  { %305 = vsyncpa [#allocation3], 1 }
 0x2ac   :  { %306 = vsyncpa [#allocation6], 1 }
 0x2ad   :  { %307 = vsyncpa [#allocation4], 1 }
 0x2ae   :  { %308 = vsyncpa [#allocation10], 1 }

</bundles_post_ra>
